<compile_context>
chip_gen: v7x
topology: tpu7x:2x2x1
jax: 0.10.0
libtpu: 0.0.40
codegen_flags: <defaults>
</compile_context>

<pallas_src>
import math

import jax
import jax.numpy as jnp
from jax.experimental import pallas as pl
from jax.experimental.pallas import tpu as pltpu


def _round_up(v, m):
    return (v + m - 1) // m * m


def _halftrap_kernel(x_ref, scale_ref, offset_ref, o_ref):
    # x_ref      : (tm, tn) tile of the flattened input
    # scale_ref  : (1, tn)  precomputed 2/(B-A)          (broadcast over rows)
    # offset_ref : (1, tn)  precomputed -A*2/(B-A) - 1   (broadcast over rows)
    z = x_ref[...] * scale_ref[...] + offset_ref[...]
    o_ref[...] = (jnp.tanh(z) * 0.5 + 0.5).astype(o_ref.dtype)


def _default_tile():
    """Generation-gated block size (rows, lanes) for f32 tiles."""
    try:
        kind = jax.devices()[0].device_kind.lower()
    except Exception:
        kind = ""
    if "v5" in kind:
        # v5e: 16 MiB default scoped VMEM -> keep 2 MiB blocks
        # (2 streams x 2 buffers x 2 MiB = 8 MiB).
        return 256, 2048
    # v6e / v7x (32 MiB default scoped VMEM): 4 MiB blocks, 16 MiB pipelined.
    return 512, 2048


def halftrap_forward(x, A, B, *, max_rows=None, max_lanes=None,
                     small_bytes=1 << 20):
    """HalfTrap forward.  x: (N, *feat) ; A, B: (*feat), broadcast over N."""
    orig_shape = x.shape
    N = orig_shape[0]
    feat_shape = orig_shape[1:]
    assert A.shape == feat_shape and B.shape == feat_shape
    F = math.prod(feat_shape)

    if max_rows is None or max_lanes is None:
        dr, dl = _default_tile()
        max_rows = dr if max_rows is None else max_rows
        max_lanes = dl if max_lanes is None else max_lanes

    # Hoist the parameter math out of the kernel (done once on the tiny
    # (1, F) params, not once per grid step / element):
    #   2*(x - A)/(B - A) - 1  ==  x*scale + offset
    # B == A gives inf/NaN here, exactly matching the reference divide.
    scale = (2.0 / (B - A)).reshape(1, F).astype(x.dtype)
    offset = (-A.reshape(1, F) * scale - 1.0).astype(x.dtype)

    x2 = x.reshape(N, F)  # row-major flatten: layout-preserving, free in XLA

    # ---- small-input fast path: one full-array block, no padding/tiling ----
    if N * F * x.dtype.itemsize <= small_bytes:
        out = pl.pallas_call(
            _halftrap_kernel,
            out_shape=jax.ShapeDtypeStruct((N, F), x.dtype),
            grid_spec=pltpu.PrefetchScalarGridSpec(
                num_scalar_prefetch=0,
                grid=(1,),
                in_specs=[
                    pl.BlockSpec((N, F), lambda i: (0, 0)),
                    pl.BlockSpec((1, F), lambda i: (0, 0)),
                    pl.BlockSpec((1, F), lambda i: (0, 0)),
                ],
                out_specs=pl.BlockSpec((N, F), lambda i: (0, 0)),
            ),
        )(x2, scale, offset)
        return out.reshape(orig_shape)

    # ---- tiled path (lane-dense, ragged trailing blocks) -------------------
    tn = min(_round_up(F, 128), max_lanes)
    tm = min(_round_up(N, 8), max_rows)

    # Guarantee >= 2 grid steps so both v7x TensorCores get work.
    if pl.cdiv(F, tn) * pl.cdiv(N, tm) == 1:
        if N >= 16:
            tm = _round_up(pl.cdiv(N, 2), 8)
        elif tn >= 256:
            tn = _round_up(pl.cdiv(F, 2), 128)

    lane_tiles = pl.cdiv(F, tn)
    row_tiles = pl.cdiv(N, tm)

    # Pad ONLY the tiny (1, F) parameter rows so their blocks never read
    # out-of-bounds garbage (benign values -> no inf/NaN in dead lanes).
    # x and the output stay unpadded: Pallas bounds the trailing block's
    # reads and drops its OOB writes, so there is no extra HBM pass.
    Fp = lane_tiles * tn
    if Fp != F:
        scale = jnp.pad(scale, ((0, 0), (0, Fp - F)), constant_values=1.0)
        offset = jnp.pad(offset, ((0, 0), (0, Fp - F)), constant_values=0.0)

    out = pl.pallas_call(
        _halftrap_kernel,
        out_shape=jax.ShapeDtypeStruct((N, F), x.dtype),
        grid_spec=pltpu.PrefetchScalarGridSpec(
            num_scalar_prefetch=0,
            # Lane axis OUTER -> (1, tn) scale/offset blocks stay resident
            # across the whole row sweep (parameters DMA'd ~once).
            grid=(lane_tiles, row_tiles),
            in_specs=[
                pl.BlockSpec((tm, tn), lambda j, i: (i, j)),
                pl.BlockSpec((1, tn), lambda j, i: (0, j)),
                pl.BlockSpec((1, tn), lambda j, i: (0, j)),
            ],
            out_specs=pl.BlockSpec((tm, tn), lambda j, i: (i, j)),
        ),
        compiler_params=pltpu.CompilerParams(
            dimension_semantics=("parallel", "parallel"),
        ),
    )(x2, scale, offset)

    return out.reshape(orig_shape)


def halftrap_reference(x, A, B):
    z = (x - A[None]) / (B[None] - A[None])
    return (jnp.tanh(z * 2.0 - 1.0) + 1.0) * 0.5


if __name__ == "__main__":
    key = jax.random.PRNGKey(0)
    kx, ka, kb, kx2 = jax.random.split(key, 4)

    # Demo shape implied by the module: batch=2, channels=4, spatial=16x16.
    N, C, H, W = 2, 4, 16, 16
    x = jax.random.normal(kx, (N, C, H, W), dtype=jnp.float32)
    # B = A + positive offset so (B - A) stays away from zero.
    A = jax.random.uniform(ka, (C, H, W), dtype=jnp.float32)
    B = A + jax.random.uniform(kb, (C, H, W), dtype=jnp.float32,
                               minval=0.5, maxval=1.5)

    out = jax.block_until_ready(halftrap_forward(x, A, B))
    ref = halftrap_reference(x, A, B)
    assert out.shape == (N, C, H, W)
    assert jnp.allclose(out, ref, atol=1e-5, rtol=1e-5), "mismatch (small path)"

    # Also exercise the tiled ragged-grid path: N not a multiple of the row
    # tile, F = 960 not a multiple of 128 (no input pad / output slice).
    N2, C2, H2, W2 = 521, 3, 16, 20
    x_big = jax.random.normal(kx2, (N2, C2, H2, W2), dtype=jnp.float32)
    ka2, kb2 = jax.random.split(ka)
    A2 = jax.random.uniform(ka2, (C2, H2, W2), dtype=jnp.float32)
    B2 = A2 + jax.random.uniform(kb2, (C2, H2, W2), dtype=jnp.float32,
                                 minval=0.5, maxval=1.5)

    out_big = jax.block_until_ready(halftrap_forward(x_big, A2, B2))
    ref_big = halftrap_reference(x_big, A2, B2)
    assert out_big.shape == x_big.shape
    assert jnp.allclose(out_big, ref_big, atol=1e-5, rtol=1e-5), \
        "mismatch (tiled path)"

    print("KERNEL_OK")
</pallas_src>

<mosaic_0001>
module attributes {stable_mosaic.version = 11 : i64} {
  func.func @_halftrap_kernel(%arg0: i32, %arg1: memref<2x1024xf32, #tpu.memory_space<vmem>>, %arg2: memref<1x1024xf32, #tpu.memory_space<vmem>>, %arg3: memref<1x1024xf32, #tpu.memory_space<vmem>>, %arg4: memref<2x1024xf32, #tpu.memory_space<vmem>>) attributes {dimension_semantics = [#tpu.dimension_semantics<arbitrary>], iteration_bounds = array<i64: 1>, scalar_prefetch = 0 : i64, scratch_operands = 0 : i64, tpu.core_type = #tpu.core_type<tc>, window_params = [{pipeline_mode = #tpu.pipeline_mode<synchronous>, transform_indices = @transform_0, window_bounds = array<i64: 2, 1024>}, {pipeline_mode = #tpu.pipeline_mode<synchronous>, transform_indices = @transform_1, window_bounds = array<i64: 1, 1024>}, {pipeline_mode = #tpu.pipeline_mode<synchronous>, transform_indices = @transform_2, window_bounds = array<i64: 1, 1024>}, {pipeline_mode = #tpu.pipeline_mode<synchronous>, transform_indices = @transform_3, window_bounds = array<i64: 2, 1024>}]} {
    %c0 = arith.constant 0 : index
    %c0_0 = arith.constant 0 : index
    %0 = vector.load %arg1[%c0, %c0_0] : memref<2x1024xf32, #tpu.memory_space<vmem>>, vector<2x1024xf32>
    %c0_1 = arith.constant 0 : index
    %c0_2 = arith.constant 0 : index
    %1 = vector.load %arg2[%c0_1, %c0_2] : memref<1x1024xf32, #tpu.memory_space<vmem>>, vector<1x1024xf32>
    %2 = vector.broadcast %1 : vector<1x1024xf32> to vector<2x1024xf32>
    %3 = arith.mulf %0, %2 : vector<2x1024xf32>
    %c0_3 = arith.constant 0 : index
    %c0_4 = arith.constant 0 : index
    %4 = vector.load %arg3[%c0_3, %c0_4] : memref<1x1024xf32, #tpu.memory_space<vmem>>, vector<1x1024xf32>
    %5 = vector.broadcast %4 : vector<1x1024xf32> to vector<2x1024xf32>
    %6 = arith.addf %3, %5 : vector<2x1024xf32>
    %7 = math.tanh %6 : vector<2x1024xf32>
    %cst = arith.constant 5.000000e-01 : f32
    %8 = vector.broadcast %cst : f32 to vector<2x1024xf32>
    %9 = arith.mulf %7, %8 : vector<2x1024xf32>
    %cst_5 = arith.constant 5.000000e-01 : f32
    %10 = vector.broadcast %cst_5 : f32 to vector<2x1024xf32>
    %11 = arith.addf %9, %10 : vector<2x1024xf32>
    %c0_6 = arith.constant 0 : index
    %c0_7 = arith.constant 0 : index
    %12 = vector.load %arg4[%c0_6, %c0_7] : memref<2x1024xf32, #tpu.memory_space<vmem>>, vector<2x1024xf32>
    tpu.vector_store %arg4[%c0_6, %c0_7], %11 {strides = array<i32>} : memref<2x1024xf32, #tpu.memory_space<vmem>>, vector<2x1024xf32>,
    return
  }
  func.func @transform_0(%arg0: i32) -> (i32, i32) {
    %c0_i32 = arith.constant 0 : i32
    %c0_i32_0 = arith.constant 0 : i32
    %c0_i32_1 = arith.constant 0 : i32
    return %c0_i32, %c0_i32_0 : i32, i32
  }
  func.func @transform_1(%arg0: i32) -> (i32, i32) {
    %c0_i32 = arith.constant 0 : i32
    %c0_i32_0 = arith.constant 0 : i32
    %c0_i32_1 = arith.constant 0 : i32
    return %c0_i32, %c0_i32_0 : i32, i32
  }
  func.func @transform_2(%arg0: i32) -> (i32, i32) {
    %c0_i32 = arith.constant 0 : i32
    %c0_i32_0 = arith.constant 0 : i32
    %c0_i32_1 = arith.constant 0 : i32
    return %c0_i32, %c0_i32_0 : i32, i32
  }
  func.func @transform_3(%arg0: i32) -> (i32, i32) {
    %c0_i32 = arith.constant 0 : i32
    %c0_i32_0 = arith.constant 0 : i32
    %c0_i32_1 = arith.constant 0 : i32
    return %c0_i32, %c0_i32_0 : i32, i32
  }
}

</mosaic_0001>

<bundles_post_ra>
// kernel: tpu_custom_call.1
= control target key start
LH: loop header
LB: loop body
LE: loop exit
PB: predicated region body
PF: predicated region fallthrough
CT: control target
= control target key end

     0   :  { %8 = vsyncpa [#allocation3], 0  ;;  %s396_s0 = inlined_call_operand.hbm [shape: f32[2,1024], index: 0, kind: input, shape index: {}]   ;;  %s397_s1 = inlined_call_operand.hbm [shape: f32[1,1024], index: 1, kind: input, shape index: {}]   ;;  %s398_s2 = inlined_call_operand.hbm [shape: f32[1,1024], index: 2, kind: input, shape index: {}]   ;;  %s399_s3 = inlined_call_operand.hbm [shape: f32[2,1024], index: 3, kind: output, shape index: {}]  }
   0x1   :  { %9 = vsyncpa [#allocation6], 0 }
   0x2   :  { %10 = vsyncpa [#allocation4], 0  ;;  %s323_s12 = smov [#allocation5]   ;;  %s324_s14 = smov [#allocation2]  }
   0x3   :  { %s27_s13 = sshll.u32 %s323_s12, 4  ;;  %s17_s15 = sshll.u32 %s324_s14, 4  ;;  %s28_s13 = int_to_ptr.vmem [resolvable:$true] %s27_s13  ;;  %s18_s15 = int_to_ptr.vmem [resolvable:$true] %s17_s15 }
   0x4   :  { %s229_s18 = scalar_lea.hbm %s397_s1, 128 }
   0x5   :  { %p230_p0 = scmp.ne.s32.totalorder %s397_s1, %s229_s18  ;;  %p233_p1 = scmp.lt.u32.totalorder %s229_s18, %s397_s1 }
   0x7   :  { %p235_p2 = pnand %p233_p1, %p230_p0 }
   0x9   :  { %238 = shalt.err (!%p235_p2)
}
   0xa   :  { %s239_s23 = scalar_lea.vmem %s28_s13, 128  ;;  %p244_p4 = scmp.lt.s32.totalorder %s28_s13, %s28_s13 }
   0xb   :  { %p240_p3 = scmp.ne.s32.totalorder %s28_s13, %s239_s23  ;;  %p245_p5 = scmp.lt.s32.totalorder %s239_s23, %s239_s23 }
   0xd   :  { %p246_p6 = por %p245_p5, %p244_p4 }
   0xf   :  { %p247_p7 = pnand %p246_p6, %p240_p3 }
  0x11   :  { %250 = shalt.err (!%p247_p7)
}
  0x12   :  { %30 = dma.hbm_to_vmem [thread:$0]  %s397_s1, 128, %s28_s13, [#allocation6]  }
  0x13   :  { %s251_s28 = scalar_lea.hbm %s396_s0, 256 }
  0x14   :  { %p252_p8 = scmp.ne.s32.totalorder %s396_s0, %s251_s28  ;;  %p255_p9 = scmp.lt.u32.totalorder %s251_s28, %s396_s0 }
  0x16   :  { %p257_p10 = pnand %p255_p9, %p252_p8 }
  0x18   :  { %260 = shalt.err (!%p257_p10)
}
  0x19   :  { %s261_s6 = scalar_lea.vmem %s18_s15, 256  ;;  %p266_p12 = scmp.lt.s32.totalorder %s18_s15, %s18_s15 }
  0x1a   :  { %p262_p11 = scmp.ne.s32.totalorder %s18_s15, %s261_s6  ;;  %p267_p13 = scmp.lt.s32.totalorder %s261_s6, %s261_s6 }
  0x1c   :  { %p268_p0 = por %p267_p13, %p266_p12 }
  0x1e   :  { %p269_p1 = pnand %p268_p0, %p262_p11 }
  0x20   :  { %272 = shalt.err (!%p269_p1)
}
  0x21   :  { %20 = dma.hbm_to_vmem [thread:$0]  %s396_s0, 256, %s18_s15, [#allocation3]  }
  0x22   :  { %s325_s8 = smov [#allocation7]   ;;  %s273_s12 = scalar_lea.hbm %s398_s2, 128 }
  0x23   :  { %s37_s9 = sshll.u32 %s325_s8, 4  ;;  %p274_p2 = scmp.ne.s32.totalorder %s398_s2, %s273_s12  ;;  %s38_s9 = int_to_ptr.vmem [resolvable:$true] %s37_s9 }
  0x24   :  { %p277_p3 = scmp.lt.u32.totalorder %s273_s12, %s398_s2 }
  0x26   :  { %p279_p4 = pnand %p277_p3, %p274_p2 }
  0x28   :  { %282 = shalt.err (!%p279_p4)
}
  0x29   :  { %s283_s18 = scalar_lea.vmem %s38_s9, 128  ;;  %p288_p6 = scmp.lt.s32.totalorder %s38_s9, %s38_s9 }
  0x2a   :  { %p284_p5 = scmp.ne.s32.totalorder %s38_s9, %s283_s18  ;;  %p289_p7 = scmp.lt.s32.totalorder %s283_s18, %s283_s18 }
  0x2c   :  { %p290_p8 = por %p289_p7, %p288_p6 }
  0x2e   :  { %p291_p9 = pnand %p290_p8, %p284_p5 }
  0x30   :  { %294 = shalt.err (!%p291_p9)
}
  0x31   :  { %40 = dma.hbm_to_vmem [thread:$0]  %s398_s2, 128, %s38_s9, [#allocation6]  }
  0x32   :  { %317 = dma.done.wait [#allocation3], 256  }
  0x33   :  { %318 = vsyncadd [#allocation3], 4294967040 }
  0x34   :  { %319 = dma.done.wait [#allocation6], 256  }
  0x35   :  { %320 = vsyncadd [#allocation6], 4294967040  ;;  %v54_v0 = vlaneseq  ;;  %v326_v1 = vmov 1983009808   ;;  %v52_v11 = vld [vmem:[#allocation5] sm:$0xff]  ;;  %v124_v13 = vld [vmem:[#allocation7] sm:$0xff] }
  0x36   :  { %v89_v2 = vunpack.c.l.s4 %v326_v1  ;;  %v50_v36 = vld [vmem:[#allocation2] sm:$0xff]  ;;  %v51_v49 = vld [vmem:[#allocation2 + $0x8] sm:$0xff]  ;;  %s327_s2 = smov [#allocation8]  }
  0x37   :  { %v55_v3 = vshrl.u32 %v54_v0, 7  ;;  %s210_s19 = sshll.u32 %s327_s2, 4  ;;  %s211_s19 = int_to_ptr.vmem [resolvable:$true] %s210_s19 }
  0x38   :  { %v90_v4 = vunpack.c.0.s8 %v89_v2  ;;  %s295_s20 = scalar_lea.vmem %s211_s19, 256  ;;  %p300_p11 = scmp.lt.s32.totalorder %s211_s19, %s211_s19 }
  0x39   :  { %v56_v5 = vsub.s32 0, %v55_v3  ;;  %v60_v6 = vsub.s32 1, %v55_v3  ;;  %v64_v7 = vsub.s32 2, %v55_v3  ;;  %v68_v8 = vsub.s32 3, %v55_v3  ;;  %p296_p10 = scmp.ne.s32.totalorder %s211_s19, %s295_s20  ;;  %p301_p12 = scmp.lt.s32.totalorder %s295_s20, %s295_s20 }
  0x3a   :  { %v72_v9 = vsub.s32 4, %v55_v3  ;;  %v76_v10 = vsub.s32 5, %v55_v3  ;;  %v93_v12 = vsub.s32 %v90_v4, %v55_v3  ;;  %v80_v14 = vsub.s32 6, %v55_v3 }
  0x3b   :  { %v84_v15 = vsub.s32 7, %v55_v3  ;;  %v57_v16 = vrot.slane %v52_v11, %v56_v5  ;;  %v61_v17 = vrot.slane %v52_v11, %v60_v6  ;;  %v65_v18 = vrot.slane %v52_v11, %v64_v7  ;;  %p302_p13 = por %p301_p12, %p300_p11 }
  0x3c   :  { %v69_v19 = vrot.slane %v52_v11, %v68_v8  ;;  %v129_v20 = vrot.slane %v124_v13, %v56_v5  ;;  %v133_v21 = vrot.slane %v124_v13, %v60_v6  ;;  %v137_v22 = vrot.slane %v124_v13, %v64_v7 }
  0x3d   :  { %v141_v23 = vrot.slane %v124_v13, %v68_v8  ;;  %v86_v24 = vcombine.low %v57_v16, %v61_v17  ;;  %v73_v26 = vrot.slane %v52_v11, %v72_v9  ;;  %v77_v27 = vrot.slane %v52_v11, %v76_v10  ;;  %p303_p0 = pnand %p302_p13, %p296_p10 }
  0x3e   :  { %v87_v25 = vcombine.low %v65_v18, %v69_v19  ;;  %v158_v28 = vcombine.low %v129_v20, %v133_v21  ;;  %v81_v30 = vrot.slane %v52_v11, %v80_v14  ;;  %v85_v31 = vrot.slane %v52_v11, %v84_v15 }
  0x3f   :  { %v159_v29 = vcombine.low %v137_v22, %v141_v23  ;;  %v94_v32 = vrot.slane %v86_v24, %v93_v12  ;;  %v103_v34 = vcombine.low %v73_v26, %v77_v27  ;;  %v145_v35 = vrot.slane %v124_v13, %v72_v9 }
  0x40   :  { %v101_v33 = vrot.slane %v87_v25, %v93_v12  ;;  %v166_v37 = vrot.slane %v158_v28, %v93_v12  ;;  %v104_v39 = vcombine.low %v81_v30, %v85_v31  ;;  %v149_v40 = vrot.slane %v124_v13, %v76_v10 }
  0x41   :  { %v173_v38 = vrot.slane %v159_v29, %v93_v12  ;;  %v111_v42 = vrot.slane %v103_v34, %v93_v12  ;;  %v153_v43 = vrot.slane %v124_v13, %v80_v14  ;;  %v157_v44 = vrot.slane %v124_v13, %v84_v15 }
  0x42   :  { %v102_v41 = vcombine.low %v94_v32, %v101_v33  ;;  %v118_v46 = vrot.slane %v104_v39, %v93_v12  ;;  %v175_v47 = vcombine.low %v145_v35, %v149_v40 }
  0x43   :  { %v174_v45 = vcombine.low %v166_v37, %v173_v38  ;;  %v176_v50 = vcombine.low %v153_v43, %v157_v44 }
  0x44   :  { %v122_v48 = vmul.f32 %v102_v41, %v50_v36  ;;  %v119_v51 = vcombine.low %v111_v42, %v118_v46  ;;  %v183_v52 = vrot.slane %v175_v47, %v93_v12 }
  0x45   :  { %v190_v54 = vrot.slane %v176_v50, %v93_v12 }
  0x46   :  { %v194_v53 = vadd.f32 %v174_v45, %v122_v48  ;;  %v123_v55 = vmul.f32 %v119_v51, %v51_v49 }
  0x47   :  { %v191_v56 = vcombine.low %v183_v52, %v190_v54 }
  0x48   :  { %225 = vtanh.f32 %v194_v53 }
  0x49   :  { %v195_v57 = vadd.f32 %v191_v56, %v123_v55 }
  0x4b   :  { %227 = vtanh.f32 %v195_v57 }
  0x52   :  { %v226_v58 = vpop.eup %225 }
  0x53   :  { %v198_v59 = vmul.f32 0.5, %v226_v58 }
  0x55   :  { %v200_v60 = vadd.f32 0.5, %v198_v59  ;;  %v228_v61 = vpop.eup %227 }
  0x56   :  { %v199_v62 = vmul.f32 0.5, %v228_v61 }
  0x57   :  { %202 = vst [vmem:[#allocation8] sm:$0xff] %v200_v60 }
  0x58   :  { %v201_v63 = vadd.f32 0.5, %v199_v62 }
  0x5a   :  { %203 = vst [vmem:[#allocation8 + $0x8] sm:$0xff] %v201_v63 }
  0x5b   :  { %306 = shalt.err (!%p303_p0)
}
  0x5c   :  { %s307_s23 = scalar_lea.hbm %s399_s3, 256 }
  0x5d   :  { %p308_p1 = scmp.ne.s32.totalorder %s399_s3, %s307_s23  ;;  %p311_p2 = scmp.lt.u32.totalorder %s307_s23, %s399_s3 }
  0x5f   :  { %p313_p3 = pnand %p311_p2, %p308_p1 }
  0x61   :  { %316 = shalt.err (!%p313_p3)
}
  0x62   :  { %213 = dma.vmem_to_hbm [thread:$0]  %s211_s19, 256, %s399_s3, [#allocation4]  }
  0x63   :  { %321 = dma.done.wait [#allocation4], 256  }
  0x64   :  { %322 = vsyncadd [#allocation4], 4294967040 }
  0x65   :  { %217 = vsyncpa [#allocation3], 1 }
  0x66   :  { %218 = vsyncpa [#allocation6], 1 }
  0x67   :  { %219 = vsyncpa [#allocation4], 1 }

</bundles_post_ra>
